<compile_context>
chip_gen: v5e
topology: v5e:2x2
jax: 0.10.0
libtpu: 0.0.40
codegen_flags: <defaults>
</compile_context>

<pallas_src>
import jax
import jax.numpy as jnp
from jax.experimental import pallas as pl
from jax.experimental.pallas import tpu as pltpu

EPSILON = 1e-4


def _fused_heads_kernel(dists_ref, pp_ref, w_ref, x_ref, ppsm_ref):
    # pp_ref: (P, H*C*D) presence logits, all heads concatenated on lanes.
    pp_logits = pp_ref[...]

    # Softmax over the prototype axis (axis 0 here == dim=1 of torch (C, P, D)),
    # independently per (head, class, descriptive) lane column.
    m = jnp.max(pp_logits, axis=0, keepdims=True)
    e = jnp.exp(pp_logits - m)
    pp_sm = e * pl.reciprocal(jnp.sum(e, axis=0, keepdims=True), approx=False)
    ppsm_ref[...] = pp_sm                                   # lane-dense (P, H*C*D) store

    # dists: (2B, P) with rows [min_distances ; avg_dist] -> single MXU matmul for both.
    dists = dists_ref[...]
    mixed = jnp.dot(dists, pp_sm, preferred_element_type=jnp.float32)   # (2B, H*C*D)
    b = dists.shape[0] // 2
    mn = mixed[:b]                                          # min-mixed distances
    av = mixed[b:]                                          # avg-mixed distances

    # distance_2_similarity('log') difference, fused into a single log (one EUP push):
    #   log((mn+1)/(mn+eps)) - log((av+1)/(av+eps))
    x = jnp.log(((mn + 1.0) * (av + EPSILON)) / ((mn + EPSILON) * (av + 1.0)))  # (B, H*C*D)

    # Last layer for all heads at once: block-diagonal transposed weight (H*C*D, H*C).
    x_ref[...] = jnp.dot(x, w_ref[...], preferred_element_type=jnp.float32)    # (B, H*C)


def multihead_forward(avg_dist, min_distances, pp_slab, w_block, gumbel_scale, *, key=None):
    """
    avg_dist, min_distances : (B, P) float32
    pp_slab                 : (P, H*C*D) float32  -- proto_presence parameter kept in slab layout
    w_block                 : (H*C*D, H*C) float32 -- block-diagonal transposed last-layer weight
    Returns (x_slab (B, H*C), min_distances (B, P), proto_presence_softmax_slab (P, H*C*D)).
    """
    B, P = min_distances.shape
    HCD = pp_slab.shape[1]
    HC = w_block.shape[1]

    # --- glue: optional gumbel noise (host-side; elementwise, layout-agnostic) ---
    if gumbel_scale == 0:
        logits = pp_slab
    else:
        # gumbel_softmax(logits*scale, tau=0.5): softmax((logits*scale + g)/tau)
        if key is None:
            key = jax.random.PRNGKey(0)  # TODO(synk): deterministic fallback, not real sampling
        g = jax.random.gumbel(key, pp_slab.shape, dtype=pp_slab.dtype)
        logits = (pp_slab * gumbel_scale + g) / 0.5

    # Stack min/avg into one LHS so the kernel does a single (2B, P) x (P, H*C*D) dot.
    dists = jnp.concatenate([min_distances, avg_dist], axis=0)          # (2B, P)

    grid_spec = pltpu.PrefetchScalarGridSpec(
        num_scalar_prefetch=0,
        grid=(1,),
        in_specs=[
            pl.BlockSpec((2 * B, P), lambda i: (0, 0)),     # stacked distances
            pl.BlockSpec((P, HCD), lambda i: (0, 0)),       # presence logits slab (all heads)
            pl.BlockSpec((HCD, HC), lambda i: (0, 0)),      # block-diagonal last-layer weight^T
        ],
        out_specs=[
            pl.BlockSpec((B, HC), lambda i: (0, 0)),        # head logits slab
            pl.BlockSpec((P, HCD), lambda i: (0, 0)),       # softmaxed presence slab
        ],
    )

    x_slab, ppsm_slab = pl.pallas_call(
        _fused_heads_kernel,
        grid_spec=grid_spec,
        out_shape=(
            jax.ShapeDtypeStruct((B, HC), jnp.float32),
            jax.ShapeDtypeStruct((P, HCD), jnp.float32),
        ),
        compiler_params=pltpu.CompilerParams(
            dimension_semantics=("arbitrary",)),
    )(dists, logits, w_block)

    # min_distances is returned as-is (no redundant (H, B, P) broadcast).
    return x_slab, min_distances, ppsm_slab


# ---------- layout helpers (only used when a consumer needs torch layout) ----------

def x_slab_to_heads(x_slab, num_heads, num_classes):
    B = x_slab.shape[0]
    return jnp.transpose(x_slab.reshape(B, num_heads, num_classes), (1, 0, 2))   # (H, B, C)


def ppsm_slab_to_torch(ppsm_slab, num_heads, num_classes, num_descriptive):
    P = ppsm_slab.shape[0]
    return jnp.transpose(
        ppsm_slab.reshape(P, num_heads, num_classes, num_descriptive), (1, 2, 0, 3))  # (H, C, P, D)


# ---------- pure-JAX reference (torch layout) ----------

def _reference_forward(avg_dist, min_distances, proto_presence, last_w_t):
    """gumbel_scale == 0 path, matches PrototypesHead.forward per head."""
    pp_sm = jax.nn.softmax(proto_presence, axis=2)          # softmax over P (dim=1 of (C,P,D))
    min_mixed = jnp.einsum('bp,hcpn->hbcn', min_distances, pp_sm)
    avg_mixed = jnp.einsum('bp,hcpn->hbcn', avg_dist, pp_sm)
    sim = lambda d: jnp.log((d + 1.0) / (d + EPSILON))
    x = sim(min_mixed) - sim(avg_mixed)
    H, B, C, D = x.shape
    x = x.reshape(H, B, C * D) @ last_w_t                   # (H, B, C)
    return x, pp_sm


def make_params(num_heads, num_classes, num_prototypes, num_descriptive,
                correct_class_connection=1.0, seed=0):
    """Deterministic init; the presence parameter is stored persistently in slab layout."""
    key = jax.random.PRNGKey(seed)
    C, P, D, H = num_classes, num_prototypes, num_descriptive, num_heads
    # xavier_normal std for a (C, P, D) tensor: sqrt(2 / (fan_in + fan_out)), fan_in=P*D, fan_out=C*D
    fan_in, fan_out = P * D, C * D
    std = (2.0 / (fan_in + fan_out)) ** 0.5
    pp_torch = std * jax.random.normal(key, (H, C, P, D), dtype=jnp.float32)
    # Persistent slab layout (P, H*C*D): column = h*C*D + c*D + d (one init-time transpose only).
    pp_slab = jnp.transpose(pp_torch, (2, 0, 1, 3)).reshape(P, H * C * D)

    # Last layer: weight (C, C*D) = ccc * prototype_class_identity^T; keep transposed (C*D, C).
    # It is a genuinely trainable dense weight in the module, so it stays a matmul operand.
    k = jnp.arange(C * D)
    last_w_t = correct_class_connection * (
        (k[:, None] // D) == jnp.arange(C)[None, :]).astype(jnp.float32)         # (C*D, C)
    # Block-diagonal (H*C*D, H*C) so all heads share one fused last-layer matmul.
    w_block = jnp.kron(jnp.eye(H, dtype=jnp.float32), last_w_t)

    # TODO(synk): 'alfa' parameter (use_thresh path) is never used by the 'log' forward; omitted.
    return pp_torch, pp_slab, last_w_t, w_block


if __name__ == "__main__":
    # Small, forward-consistent shapes
    num_heads = 2          # H
    num_classes = 8        # C
    num_prototypes = 16    # P
    num_descriptive = 4    # D
    batch = 8              # B

    key = jax.random.PRNGKey(0)
    k1, k2 = jax.random.split(key)
    # distances are non-negative in the original model (L2 distances)
    avg_dist = jax.random.uniform(k1, (batch, num_prototypes), jnp.float32) * 2.0
    min_distances = jax.random.uniform(k2, (batch, num_prototypes), jnp.float32)

    pp_torch, pp_slab, last_w_t, w_block = make_params(
        num_heads, num_classes, num_prototypes, num_descriptive,
        correct_class_connection=1.0, seed=0)

    x_slab, min_out, ppsm_slab = multihead_forward(
        avg_dist, min_distances, pp_slab, w_block, gumbel_scale=0)
    jax.block_until_ready((x_slab, min_out, ppsm_slab))

    # Convert slabs to torch layout only for the correctness check.
    x = x_slab_to_heads(x_slab, num_heads, num_classes)
    pp_sm = ppsm_slab_to_torch(ppsm_slab, num_heads, num_classes, num_descriptive)

    x_ref, pp_sm_ref = _reference_forward(avg_dist, min_distances, pp_torch, last_w_t)
    assert x.shape == (num_heads, batch, num_classes)
    assert min_out.shape == (batch, num_prototypes)
    assert pp_sm.shape == (num_heads, num_classes, num_prototypes, num_descriptive)
    assert jnp.allclose(x, x_ref, atol=1e-4, rtol=1e-4)
    assert jnp.allclose(pp_sm, pp_sm_ref, atol=1e-5, rtol=1e-5)

    print("KERNEL_OK")
</pallas_src>

<mosaic_0001>
module attributes {stable_mosaic.version = 11 : i64} {
  func.func @_fused_heads_kernel(%arg0: i32, %arg1: memref<16x16xf32, #tpu.memory_space<vmem>>, %arg2: memref<16x64xf32, #tpu.memory_space<vmem>>, %arg3: memref<64x16xf32, #tpu.memory_space<vmem>>, %arg4: memref<8x16xf32, #tpu.memory_space<vmem>>, %arg5: memref<16x64xf32, #tpu.memory_space<vmem>>) attributes {dimension_semantics = [#tpu.dimension_semantics<arbitrary>], iteration_bounds = array<i64: 1>, scalar_prefetch = 0 : i64, scratch_operands = 0 : i64, tpu.core_type = #tpu.core_type<tc>, window_params = [{pipeline_mode = #tpu.pipeline_mode<synchronous>, transform_indices = @transform_0, window_bounds = array<i64: 16, 16>}, {pipeline_mode = #tpu.pipeline_mode<synchronous>, transform_indices = @transform_1, window_bounds = array<i64: 16, 64>}, {pipeline_mode = #tpu.pipeline_mode<synchronous>, transform_indices = @transform_2, window_bounds = array<i64: 64, 16>}, {pipeline_mode = #tpu.pipeline_mode<synchronous>, transform_indices = @transform_3, window_bounds = array<i64: 8, 16>}, {pipeline_mode = #tpu.pipeline_mode<synchronous>, transform_indices = @transform_4, window_bounds = array<i64: 16, 64>}]} {
    %c0 = arith.constant 0 : index
    %c0_0 = arith.constant 0 : index
    %0 = vector.load %arg2[%c0, %c0_0] : memref<16x64xf32, #tpu.memory_space<vmem>>, vector<16x64xf32>
    %cst = arith.constant dense<0xFF800000> : vector<64xf32>
    %1 = vector.multi_reduction <maximumf>, %0, %cst [0] : vector<16x64xf32> to vector<64xf32>
    %2 = vector.shape_cast %1 : vector<64xf32> to vector<1x64xf32>
    %3 = vector.broadcast %2 : vector<1x64xf32> to vector<16x64xf32>
    %4 = arith.subf %0, %3 : vector<16x64xf32>
    %5 = math.exp %4 : vector<16x64xf32>
    %cst_1 = arith.constant dense<0.000000e+00> : vector<64xf32>
    %6 = vector.multi_reduction <add>, %5, %cst_1 [0] : vector<16x64xf32> to vector<64xf32>
    %7 = vector.shape_cast %6 : vector<64xf32> to vector<1x64xf32>
    %8 = tpu.reciprocal %7 : vector<1x64xf32> -> vector<1x64xf32>
    %9 = vector.broadcast %8 : vector<1x64xf32> to vector<16x64xf32>
    %10 = arith.mulf %5, %9 : vector<16x64xf32>
    %c0_2 = arith.constant 0 : index
    %c0_3 = arith.constant 0 : index
    %11 = vector.load %arg5[%c0_2, %c0_3] : memref<16x64xf32, #tpu.memory_space<vmem>>, vector<16x64xf32>
    tpu.vector_store %arg5[%c0_2, %c0_3], %10 {strides = array<i32>} : memref<16x64xf32, #tpu.memory_space<vmem>>, vector<16x64xf32>,
    %c0_4 = arith.constant 0 : index
    %c0_5 = arith.constant 0 : index
    %12 = vector.load %arg1[%c0_4, %c0_5] : memref<16x16xf32, #tpu.memory_space<vmem>>, vector<16x16xf32>
    %cst_6 = arith.constant dense<0.000000e+00> : vector<16x64xf32>
    %13 = tpu.matmul %12, %10, %cst_6 {dimension_numbers = #tpu.dot_dimension_numbers<[1], [0], [0], [1], [0, 0, 1, 1], [], []>} : vector<16x16xf32>, vector<16x64xf32>, vector<16x64xf32> -> vector<16x64xf32>
    %14 = vector.extract_strided_slice %13 {offsets = [0, 0], sizes = [8, 64], strides = [1, 1]} : vector<16x64xf32> to vector<8x64xf32>
    %15 = vector.extract_strided_slice %13 {offsets = [8, 0], sizes = [8, 64], strides = [1, 1]} : vector<16x64xf32> to vector<8x64xf32>
    %cst_7 = arith.constant 1.000000e+00 : f32
    %16 = vector.broadcast %cst_7 : f32 to vector<8x64xf32>
    %17 = arith.addf %14, %16 : vector<8x64xf32>
    %cst_8 = arith.constant 9.99999974E-5 : f32
    %18 = vector.broadcast %cst_8 : f32 to vector<8x64xf32>
    %19 = arith.addf %15, %18 : vector<8x64xf32>
    %20 = arith.mulf %17, %19 : vector<8x64xf32>
    %cst_9 = arith.constant 9.99999974E-5 : f32
    %21 = vector.broadcast %cst_9 : f32 to vector<8x64xf32>
    %22 = arith.addf %14, %21 : vector<8x64xf32>
    %cst_10 = arith.constant 1.000000e+00 : f32
    %23 = vector.broadcast %cst_10 : f32 to vector<8x64xf32>
    %24 = arith.addf %15, %23 : vector<8x64xf32>
    %25 = arith.mulf %22, %24 : vector<8x64xf32>
    %26 = arith.divf %20, %25 : vector<8x64xf32>
    %27 = math.log %26 : vector<8x64xf32>
    %c0_11 = arith.constant 0 : index
    %c0_12 = arith.constant 0 : index
    %28 = vector.load %arg3[%c0_11, %c0_12] : memref<64x16xf32, #tpu.memory_space<vmem>>, vector<64x16xf32>
    %cst_13 = arith.constant dense<0.000000e+00> : vector<8x16xf32>
    %29 = tpu.matmul %27, %28, %cst_13 {dimension_numbers = #tpu.dot_dimension_numbers<[1], [0], [0], [1], [0, 0, 1, 1], [], []>} : vector<8x64xf32>, vector<64x16xf32>, vector<8x16xf32> -> vector<8x16xf32>
    %c0_14 = arith.constant 0 : index
    %c0_15 = arith.constant 0 : index
    %30 = vector.load %arg4[%c0_14, %c0_15] : memref<8x16xf32, #tpu.memory_space<vmem>>, vector<8x16xf32>
    tpu.vector_store %arg4[%c0_14, %c0_15], %29 {strides = array<i32>} : memref<8x16xf32, #tpu.memory_space<vmem>>, vector<8x16xf32>,
    return
  }
  func.func @transform_0(%arg0: i32) -> (i32, i32) {
    %c0_i32 = arith.constant 0 : i32
    %c0_i32_0 = arith.constant 0 : i32
    %c0_i32_1 = arith.constant 0 : i32
    return %c0_i32, %c0_i32_0 : i32, i32
  }
  func.func @transform_1(%arg0: i32) -> (i32, i32) {
    %c0_i32 = arith.constant 0 : i32
    %c0_i32_0 = arith.constant 0 : i32
    %c0_i32_1 = arith.constant 0 : i32
    return %c0_i32, %c0_i32_0 : i32, i32
  }
  func.func @transform_2(%arg0: i32) -> (i32, i32) {
    %c0_i32 = arith.constant 0 : i32
    %c0_i32_0 = arith.constant 0 : i32
    %c0_i32_1 = arith.constant 0 : i32
    return %c0_i32, %c0_i32_0 : i32, i32
  }
  func.func @transform_3(%arg0: i32) -> (i32, i32) {
    %c0_i32 = arith.constant 0 : i32
    %c0_i32_0 = arith.constant 0 : i32
    %c0_i32_1 = arith.constant 0 : i32
    return %c0_i32, %c0_i32_0 : i32, i32
  }
  func.func @transform_4(%arg0: i32) -> (i32, i32) {
    %c0_i32 = arith.constant 0 : i32
    %c0_i32_0 = arith.constant 0 : i32
    %c0_i32_1 = arith.constant 0 : i32
    return %c0_i32, %c0_i32_0 : i32, i32
  }
}

</mosaic_0001>

<bundles_post_ra>
// kernel: tpu_custom_call.1
= control target key start
LH: loop header
LB: loop body
LE: loop exit
PB: predicated region body
PF: predicated region fallthrough
CT: control target
= control target key end

     0   :  { %10 = vsyncpa [#allocation3], 0  ;;  %vm20_vm0 = vcmask 523264   ;;  %s334_s0 = inlined_call_operand.vmem [shape: f32[16,16], index: 0, kind: input, shape index: {}]   ;;  %s335_s1 = inlined_call_operand.vmem [shape: f32[16,64], index: 1, kind: input, shape index: {}]   ;;  %s336_s2 = inlined_call_operand.vmem [shape: f32[64,16], index: 2, kind: input, shape index: {}]   ;;  %s337_s3 = inlined_call_operand.hbm [shape: f32[8,16], index: 3, kind: output, shape index: {0}]   ;;  %s338_s4 = inlined_call_operand.hbm [shape: f32[16,64], index: 4, kind: output, shape index: {1}]  }
   0x1   :  { %v18_v0 = vld [vmem:[%s335_s1] sm:$0xff]  ;;  %v19_v1 = vld [vmem:[%s335_s1 + $0x8] sm:$0xff] }
   0x2   :  { %11 = vsyncpa [#allocation5], 0  ;;  %v21_v2 = vsel %vm20_vm0, %v18_v0, -inf  ;;  %v22_v3 = vsel %vm20_vm0, %v19_v1, -inf  ;;  %v63_v38 = vld [vmem:[%s334_s0] sm:$0xff]  ;;  %vm65_vm5 = vcmask 130048  }
   0x3   :  { %v23_v4 = vmax.f32 %v21_v2, %v22_v3  ;;  %v64_v39 = vld [vmem:[%s334_s0 + $0x8] sm:$0xff]  ;;  %v125_v40 = vld [vmem:[%s336_s2 + $0x38] sm:$0xff]  ;;  %v124_v41 = vld [vmem:[%s336_s2 + $0x30] sm:$0xff]  ;;  %s167_s14 = sshll.u32 %s338_s4, 4  ;;  %s254_s15 = smov 128   ;;  %s168_s14 = int_to_ptr.hbm [resolvable:$true] %s167_s14 }
   0x4   :  { %137 = vmatpush.msra.mxu1 %v125_v40  ;;  %v123_v42 = vld [vmem:[%s336_s2 + $0x28] sm:$0xff]  ;;  %v122_v43 = vld [vmem:[%s336_s2 + $0x20] sm:$0xff]  ;;  %v121_v45 = vld [vmem:[%s336_s2 + $0x18] sm:$0xff]  ;;  %s255_s16 = smov 8   ;;  %s256_s17 = smov [#allocation2]  }
   0x5   :  { %v24_v5 = vrot.slane %v23_v4, 4  ;;  %v120_v46 = vld [vmem:[%s336_s2 + $0x10] sm:$0xff]  ;;  %v119_v47 = vld [vmem:[%s336_s2 + $0x8] sm:$0xff]  ;;  %v118_v48 = vld [vmem:[%s336_s2] sm:$0xff]  ;;  %s253_s2 = smov [#allocation4]   ;;  %s155_s18 = sshll.u32 %s256_s17, 4  ;;  %s156_s18 = int_to_ptr.vmem [resolvable:$true] %s155_s18 }
   0x6   :  { %138 = vmatpush.msra.mxu1 %v124_v41  ;;  %s165_s11 = sshll.u32 %s253_s2, 4  ;;  %s157_s20 = sshll.u32 %s337_s3, 4  ;;  %s166_s11 = int_to_ptr.vmem [resolvable:$true] %s165_s11  ;;  %s158_s20 = int_to_ptr.hbm [resolvable:$true] %s157_s20 }
   0x7   :  { %v25_v6 = vmax.f32 %v23_v4, %v24_v5 }
   0x8   :  { %139 = vmatpush.msra.mxu1 %v123_v42 }
   0x9   :  { %v26_v7 = vrot.slane %v25_v6, 2 }
   0xa   :  { %140 = vmatpush.msra.mxu1 %v122_v43 }
   0xb   :  { %v27_v8 = vmax.f32 %v25_v6, %v26_v7 }
   0xc   :  { %141 = vmatpush.msra.mxu1 %v121_v45 }
   0xd   :  { %v28_v9 = vrot.slane %v27_v8, 1 }
   0xe   :  { %142 = vmatpush.msra.mxu1 %v120_v46 }
   0xf   :  { %v29_v10 = vmax.f32 %v27_v8, %v28_v9 }
  0x10   :  { %143 = vmatpush.msra.mxu1 %v119_v47 }
  0x11   :  { %v30_v11 = vsub.f32 %v18_v0, %v29_v10  ;;  %v31_v12 = vsub.f32 %v19_v1, %v29_v10 }
  0x12   :  { %144 = vmatpush.msra.mxu1 %v118_v48 }
  0x13   :  { %v32_v13 = vmul.f32 1.442695, %v30_v11  ;;  %v34_v14 = vmul.f32 1.442695, %v31_v12 }
  0x15   :  { %191 = vpow2.f32 %v32_v13 }
  0x16   :  { %193 = vpow2.f32 %v34_v14 }
  0x1b   :  { %v192_v15 = vpop.eup %191 }
  0x1c   :  { %v194_v16 = vpop.eup %193  ;;  %v36_v17 = vsel %vm20_vm0, %v192_v15, 0.0 }
  0x1d   :  { %v37_v18 = vsel %vm20_vm0, %v194_v16, 0.0 }
  0x1e   :  { %v38_v19 = vadd.f32 %v37_v18, %v36_v17 }
  0x20   :  { %v39_v20 = vrot.slane %v38_v19, 4 }
  0x22   :  { %v40_v21 = vadd.f32 %v39_v20, %v38_v19 }
  0x24   :  { %v41_v22 = vrot.slane %v40_v21, 2 }
  0x26   :  { %v42_v23 = vadd.f32 %v41_v22, %v40_v21 }
  0x28   :  { %v43_v24 = vrot.slane %v42_v23, 1 }
  0x2a   :  { %v44_v25 = vadd.f32 %v43_v24, %v42_v23 }
  0x2c   :  { %195 = vrcp.f32 %v44_v25  ;;  %v56_v28 = vand.u32 2147483648, %v44_v25  ;;  %vm50_vm1 = vweird.f32 %v44_v25  ;;  %v54_v30 = vand.u32 2147483647, %v44_v25 }
  0x2e   :  { %v57_v32 = vor.u32 1.1754944e-38, %v56_v28  ;;  %vm55_vm4 = vcmp.eq.f32.partialorder %v54_v30, 8.507059e+37 }
  0x32   :  { %v196_v26 = vpop.eup %195 }
  0x33   :  { %v46_v27 = vmul.f32 %v196_v26, %v44_v25  ;;  %vm51_vm2 = vweird.f32 %v196_v26 }
  0x34   :  { %vm52_vm3 = vmor %vm50_vm1, %vm51_vm2 }
  0x35   :  { %v47_v29 = vsub.f32 1.0, %v46_v27 }
  0x37   :  { %v48_v31 = vmul.f32 %v196_v26, %v47_v29 }
  0x39   :  { %v49_v33 = vadd.f32 %v196_v26, %v48_v31 }
  0x3b   :  { %v53_v34 = vsel %vm52_vm3, %v196_v26, %v49_v33 }
  0x3c   :  { %v58_v35 = vsel %vm55_vm4, %v57_v32, %v53_v34 }
  0x3d   :  { %v60_v36 = vmul.f32 %v194_v16, %v58_v35  ;;  %v59_v37 = vmul.f32 %v192_v15, %v58_v35 }
  0x3f   :  { %62 = vst.msk [vmem:[#allocation4 + $0x8] sm:$0xff] %vm20_vm0, %v60_v36  ;;  %86 = vmatpush.msra.mxu0 %v60_v36 }
  0x40   :  { %61 = vst.msk [vmem:[#allocation4] sm:$0xff] %vm20_vm0, %v59_v37 }
  0x41   :  { %87 = vmatpush.msra.mxu0 %v59_v37  ;;  %173 = dma.vmem_to_hbm [thread:$0]  %s166_s11, 256, %s168_s14, [#allocation5], %s254_s15, %s254_s15, %s255_s16  }
  0x42   :  { %184 = vmatmul.msk.f32.vlgmr.msra.gmra.mxu0 %vm65_vm5, %v63_v38 }
  0x4a   :  { %185 = vmatmul.msk.f32.gmra.mxu0 %vm65_vm5, %v64_v39 }
  0xbf   :  { %v89_v44 = vpop.f32.mrf.mxu0 }
  0xc0   :  { %v98_v50 = vadd.f32 0.0001, %v89_v44  ;;  %v95_v60 = vadd.f32 1.0, %v89_v44 }
  0xc7   :  { %v92_v49 = vpop.f32.mrf.mxu0 }
  0xc8   :  { %v99_v51 = vadd.f32 1.0, %v92_v49  ;;  %v96_v57 = vadd.f32 0.0001, %v92_v49 }
  0xca   :  { %v100_v52 = vmul.f32 %v99_v51, %v98_v50  ;;  %v97_v63 = vmul.f32 %v96_v57, %v95_v60 }
  0xcc   :  { %197 = vrcp.f32 %v100_v52  ;;  %v112_v56 = vand.u32 2147483648, %v100_v52  ;;  %v110_v59 = vand.u32 2147483647, %v100_v52  ;;  %vm106_vm7 = vweird.f32 %v100_v52 }
  0xce   :  { %v113_v62 = vor.u32 1.1754944e-38, %v112_v56  ;;  %vm111_vm9 = vcmp.eq.f32.partialorder %v110_v59, 8.507059e+37 }
  0xd2   :  { %v198_v53 = vpop.eup %197 }
  0xd3   :  { %v102_v54 = vmul.f32 %v198_v53, %v100_v52  ;;  %vm107_vm6 = vweird.f32 %v198_v53 }
  0xd4   :  { %vm108_vm8 = vmor %vm106_vm7, %vm107_vm6 }
  0xd5   :  { %v103_v55 = vsub.f32 1.0, %v102_v54 }
  0xd7   :  { %v104_v58 = vmul.f32 %v198_v53, %v103_v55 }
  0xd9   :  { %v105_v61 = vadd.f32 %v198_v53, %v104_v58 }
  0xdb   :  { %v109_v0 = vsel %vm108_vm8, %v198_v53, %v105_v61 }
  0xdc   :  { %v114_v1 = vsel %vm111_vm9, %v113_v62, %v109_v0 }
  0xdd   :  { %v115_v2 = vmul.f32 %v114_v1, %v97_v63 }
  0xdf   :  { %199 = vlog2.f32 %v115_v2 }
  0xe5   :  { %v200_v3 = vpop.eup %199 }
  0xe6   :  { %v117_v4 = vmul.f32 0.6931472, %v200_v3 }
  0xe8   :  { %186 = vmatmul.msk.f32.vlgmr.msra.gmra.mxu1 %vm20_vm0, %v117_v4 }
 0x165   :  { %v146_v5 = vpop.f32.mrf.mxu1 }
 0x166   :  { %149 = vst.msk [vmem:[#allocation2] sm:$0xff] %vm65_vm5, %v146_v5 }
 0x167   :  { %160 = dma.vmem_to_hbm [thread:$0]  %s156_s18, 128, %s158_s20, [#allocation3]  }
 0x168   :  { %249 = dma.done.wait [#allocation3], 128  }
 0x169   :  { %250 = vsyncadd [#allocation3], 4294967168 }
 0x16a   :  { %251 = dma.done.wait [#allocation5], 256  }
 0x16b   :  { %252 = vsyncadd [#allocation5], 4294967040 }
 0x16c   :  { %182 = vsyncpa [#allocation3], 1 }
 0x16d   :  { %183 = vsyncpa [#allocation5], 1 }

</bundles_post_ra>
